<compile_context>
chip_gen: v7x
topology: tpu7x:2x2x1
jax: 0.10.0
libtpu: 0.0.40
codegen_flags: <defaults>
</compile_context>

<pallas_src>
import functools

import jax
import jax.numpy as jnp
from jax import lax
from jax.experimental import pallas as pl
from jax.experimental.pallas import tpu as pltpu


def _round_up(n, m):
    return ((n + m - 1) // m) * m


def _pad_to(x, shape):
    pads = [(0, t - s) for s, t in zip(x.shape, shape)]
    return jnp.pad(x, pads)


def mlp_baseline_kernel(ids_ref, emb_ref, w1_ref, b1_ref, w2_ref, b2_ref, out_ref,
                        *, compute_dtype):
    ids = ids_ref[...]                                   # [bB, S] int32
    bB, S = ids.shape
    Vp = emb_ref.shape[0]

    # counts[b, v]: integer accumulation over the (tiny, static) sequence axis,
    # single f32 convert + (1/S) scale at the end.  Lane axis = vocab (padded to 128).
    # NOTE: 1/S is exact only for power-of-two S (S=8 here); otherwise last-ulp diff vs. /S.
    vocab_iota = lax.broadcasted_iota(jnp.int32, (bB, Vp), 1)           # [bB, Vp]
    counts_i = jnp.zeros((bB, Vp), jnp.int32)
    for s in range(S):   # S is tiny & static -> unrolled.  TODO(synk): fori_loop(unroll=4) if S > ~16.
        counts_i = counts_i + (ids[:, s:s + 1] == vocab_iota).astype(jnp.int32)
    counts = (counts_i.astype(jnp.float32) * (1.0 / S)).astype(compute_dtype)

    # mean_s E[ids[b, s]]  ==  (counts * 1/S) @ E        (single MXU matmul, f32 accumulation)
    mean_emb = jnp.dot(counts, emb_ref[...],
                       preferred_element_type=jnp.float32)              # [bB, Ep] f32

    # MLP: Linear -> ReLU -> Linear (operands in compute_dtype, f32 accumulation, f32 bias add)
    h = jnp.dot(mean_emb.astype(compute_dtype), w1_ref[...],
                preferred_element_type=jnp.float32) + b1_ref[...]       # [bB, Hp]
    h = jnp.maximum(h, 0.0)
    out = jnp.dot(h.astype(compute_dtype), w2_ref[...],
                  preferred_element_type=jnp.float32) + b2_ref[...]     # [bB, Op]
    out_ref[...] = out.astype(out_ref.dtype)


def prepare_params(emb, w1, b1, w2, b2, *, use_bf16=True):
    """Pad (and optionally bf16-cast) parameters ONCE, not per forward call."""
    V, E = emb.shape
    H = w1.shape[1]
    O = w2.shape[1]
    Vp, Ep, Hp, Op = (_round_up(d, 128) for d in (V, E, H, O))
    pdt = jnp.bfloat16 if use_bf16 else jnp.float32
    return {
        "emb": _pad_to(emb, (Vp, Ep)).astype(pdt),
        "w1": _pad_to(w1, (Ep, Hp)).astype(pdt),
        "b1": _pad_to(b1.reshape(1, -1), (1, Hp)).astype(jnp.float32),
        "w2": _pad_to(w2, (Hp, Op)).astype(pdt),
        "b2": _pad_to(b2.reshape(1, -1), (1, Op)).astype(jnp.float32),
        "out_dim": O,
        "compute_dtype": pdt,
    }


def mlp_baseline_apply(ids, params, *, max_batch_tile=128):
    B, S = ids.shape
    emb_p, w1_p, b1_p, w2_p, b2_p = (params[k] for k in ("emb", "w1", "b1", "w2", "b2"))
    Vp, Ep = emb_p.shape
    Hp = w1_p.shape[1]
    Op = w2_p.shape[1]

    # Batch tile: as wide as the MXU likes (128), clamped for tiny batches so we don't
    # burn compute on padding; 16-row granularity keeps bf16 sublane packing happy.
    batch_tile = min(max_batch_tile, _round_up(B, 16))
    Bp = _round_up(B, batch_tile)
    ids_p = _pad_to(ids.astype(jnp.int32), (Bp, S))      # padded rows -> id 0 -> sliced off
    grid = (Bp // batch_tile,)

    # VMEM budget: single-buffered residents + double-buffered ids/out tiles + working set.
    psize = emb_p.dtype.itemsize
    resident_bytes = (emb_p.size + w1_p.size + w2_p.size) * psize + (b1_p.size + b2_p.size) * 4
    tile_bytes = 2 * (batch_tile * S * 4 + batch_tile * Op * 4)
    work_bytes = batch_tile * (Vp + Ep + Hp) * 4
    vmem_limit = int(min(max(2 * (resident_bytes + tile_bytes + work_bytes), 32 << 20), 64 << 20))

    flops = 2 * Bp * (Vp * Ep + Ep * Hp + Hp * Op)
    bytes_accessed = int(ids_p.size * 4 + resident_bytes + Bp * Op * 4)

    kernel = functools.partial(mlp_baseline_kernel, compute_dtype=params["compute_dtype"])

    out_p = pl.pallas_call(
        kernel,
        out_shape=jax.ShapeDtypeStruct((Bp, Op), jnp.float32),
        grid_spec=pltpu.PrefetchScalarGridSpec(
            num_scalar_prefetch=0,
            grid=grid,
            in_specs=[
                # ids tile: pipelined (default double-buffered) across batch tiles.
                pl.BlockSpec((batch_tile, S), lambda i: (i, 0)),
                # Resident tables/weights/biases: constant block index -> single buffer.
                pl.BlockSpec((Vp, Ep), lambda i: (0, 0), pipeline_mode=pl.Buffered(1)),
                pl.BlockSpec((Ep, Hp), lambda i: (0, 0), pipeline_mode=pl.Buffered(1)),
                pl.BlockSpec((1, Hp), lambda i: (0, 0), pipeline_mode=pl.Buffered(1)),
                pl.BlockSpec((Hp, Op), lambda i: (0, 0), pipeline_mode=pl.Buffered(1)),
                pl.BlockSpec((1, Op), lambda i: (0, 0), pipeline_mode=pl.Buffered(1)),
            ],
            out_specs=pl.BlockSpec((batch_tile, Op), lambda i: (i, 0)),
        ),
        compiler_params=pltpu.CompilerParams(
            dimension_semantics=("parallel",),   # batch tiles shard across TCs on v7x
            vmem_limit_bytes=vmem_limit,
        ),
        cost_estimate=pl.CostEstimate(
            flops=flops, transcendentals=0, bytes_accessed=bytes_accessed),
    )(ids_p, emb_p, w1_p, b1_p, w2_p, b2_p)

    return out_p[:B, :params["out_dim"]]


def mlp_baseline(ids, emb, w1, b1, w2, b2, *, use_bf16=True, max_batch_tile=128):
    # Convenience wrapper (pads params per call); prefer prepare_params + mlp_baseline_apply.
    params = prepare_params(emb, w1, b1, w2, b2, use_bf16=use_bf16)
    return mlp_baseline_apply(ids, params, max_batch_tile=max_batch_tile)


def reference_forward(ids, emb, w1, b1, w2, b2):
    # Pure-JAX reference matching the PyTorch module semantics.
    x = jnp.take(emb, ids, axis=0)           # [B, S, E]
    x = jnp.mean(x, axis=1)                  # [B, E]
    h = jnp.maximum(x @ w1 + b1, 0.0)        # [B, H]
    return h @ w2 + b2                       # [B, O]


if __name__ == "__main__":
    # Small shapes consistent with the module's forward.
    vocab_size, emb_dim, hidden_dim, out_dim = 32, 16, 32, 8
    batch, seq = 4, 8

    key = jax.random.PRNGKey(0)
    k_emb, k_w1, k_b1, k_w2, k_b2, k_ids = jax.random.split(key, 6)

    # Deterministic parameter init (shapes from the module's __init__).
    emb = jax.random.normal(k_emb, (vocab_size, emb_dim), jnp.float32)
    emb = emb.at[0].set(0.0)                                   # padding_idx=0 row is zero
    lim1 = 1.0 / (emb_dim ** 0.5)
    w1 = jax.random.uniform(k_w1, (emb_dim, hidden_dim), jnp.float32, -lim1, lim1)
    b1 = jax.random.uniform(k_b1, (hidden_dim,), jnp.float32, -lim1, lim1)
    lim2 = 1.0 / (hidden_dim ** 0.5)
    w2 = jax.random.uniform(k_w2, (hidden_dim, out_dim), jnp.float32, -lim2, lim2)
    b2 = jax.random.uniform(k_b2, (out_dim,), jnp.float32, -lim2, lim2)

    # Token ids with some padding (0) tokens.
    ids = jax.random.randint(k_ids, (batch, seq), 0, vocab_size, jnp.int32)
    ids = ids.at[:, -2:].set(0)

    ref = reference_forward(ids, emb, w1, b1.reshape(1, -1), w2, b2.reshape(1, -1))

    # f32 path: exact check against the reference.
    params_f32 = prepare_params(emb, w1, b1, w2, b2, use_bf16=False)
    out_f32 = jax.block_until_ready(mlp_baseline_apply(ids, params_f32))
    assert out_f32.shape == (batch, out_dim)
    assert jnp.allclose(out_f32, ref, atol=1e-5, rtol=1e-5), "f32 kernel mismatch vs reference"

    # bf16-operand path (default perf configuration): loose tolerance for mantissa loss.
    params_bf16 = prepare_params(emb, w1, b1, w2, b2, use_bf16=True)
    out_bf16 = jax.block_until_ready(mlp_baseline_apply(ids, params_bf16))
    assert out_bf16.shape == (batch, out_dim)
    assert jnp.allclose(out_bf16, ref, atol=5e-2, rtol=5e-2), "bf16 kernel mismatch vs reference"

    print("KERNEL_OK")
</pallas_src>

<mosaic_0001>
module attributes {stable_mosaic.version = 11 : i64} {
  func.func @mlp_baseline_kernel(%arg0: i32, %arg1: memref<16x8xi32, #tpu.memory_space<vmem>>, %arg2: memref<128x128xf32, #tpu.memory_space<vmem>>, %arg3: memref<128x128xf32, #tpu.memory_space<vmem>>, %arg4: memref<1x128xf32, #tpu.memory_space<vmem>>, %arg5: memref<128x128xf32, #tpu.memory_space<vmem>>, %arg6: memref<1x128xf32, #tpu.memory_space<vmem>>, %arg7: memref<16x128xf32, #tpu.memory_space<vmem>>) attributes {dimension_semantics = [#tpu.dimension_semantics<parallel>], iteration_bounds = array<i64: 1>, scalar_prefetch = 0 : i64, scratch_operands = 0 : i64, tpu.core_type = #tpu.core_type<tc>, window_params = [{transform_indices = @transform_0, window_bounds = array<i64: 16, 8>}, {pipeline_mode = #tpu.pipeline_mode<synchronous>, transform_indices = @transform_1, window_bounds = array<i64: 128, 128>}, {pipeline_mode = #tpu.pipeline_mode<synchronous>, transform_indices = @transform_2, window_bounds = array<i64: 128, 128>}, {pipeline_mode = #tpu.pipeline_mode<synchronous>, transform_indices = @transform_3, window_bounds = array<i64: 1, 128>}, {pipeline_mode = #tpu.pipeline_mode<synchronous>, transform_indices = @transform_4, window_bounds = array<i64: 128, 128>}, {pipeline_mode = #tpu.pipeline_mode<synchronous>, transform_indices = @transform_5, window_bounds = array<i64: 1, 128>}, {transform_indices = @transform_6, window_bounds = array<i64: 16, 128>}]} {
    %c0 = arith.constant 0 : index
    %c0_0 = arith.constant 0 : index
    %0 = vector.load %arg1[%c0, %c0_0] : memref<16x8xi32, #tpu.memory_space<vmem>>, vector<16x8xi32>
    %1 = tpu.iota {dimensions = array<i32: 1>} : vector<16x128xi32>
    %c0_i32 = arith.constant 0 : i32
    %2 = vector.broadcast %c0_i32 : i32 to vector<16x128xi32>
    %3 = vector.extract_strided_slice %0 {offsets = [0, 0], sizes = [16, 1], strides = [1, 1]} : vector<16x8xi32> to vector<16x1xi32>
    %4 = vector.broadcast %3 : vector<16x1xi32> to vector<16x128xi32>
    %5 = arith.cmpi eq, %4, %1 : vector<16x128xi32>
    %6 = arith.extui %5 : vector<16x128xi1> to vector<16x128xi32>
    %7 = arith.addi %2, %6 : vector<16x128xi32>
    %8 = vector.extract_strided_slice %0 {offsets = [0, 1], sizes = [16, 1], strides = [1, 1]} : vector<16x8xi32> to vector<16x1xi32>
    %9 = vector.broadcast %8 : vector<16x1xi32> to vector<16x128xi32>
    %10 = arith.cmpi eq, %9, %1 : vector<16x128xi32>
    %11 = arith.extui %10 : vector<16x128xi1> to vector<16x128xi32>
    %12 = arith.addi %7, %11 : vector<16x128xi32>
    %13 = vector.extract_strided_slice %0 {offsets = [0, 2], sizes = [16, 1], strides = [1, 1]} : vector<16x8xi32> to vector<16x1xi32>
    %14 = vector.broadcast %13 : vector<16x1xi32> to vector<16x128xi32>
    %15 = arith.cmpi eq, %14, %1 : vector<16x128xi32>
    %16 = arith.extui %15 : vector<16x128xi1> to vector<16x128xi32>
    %17 = arith.addi %12, %16 : vector<16x128xi32>
    %18 = vector.extract_strided_slice %0 {offsets = [0, 3], sizes = [16, 1], strides = [1, 1]} : vector<16x8xi32> to vector<16x1xi32>
    %19 = vector.broadcast %18 : vector<16x1xi32> to vector<16x128xi32>
    %20 = arith.cmpi eq, %19, %1 : vector<16x128xi32>
    %21 = arith.extui %20 : vector<16x128xi1> to vector<16x128xi32>
    %22 = arith.addi %17, %21 : vector<16x128xi32>
    %23 = vector.extract_strided_slice %0 {offsets = [0, 4], sizes = [16, 1], strides = [1, 1]} : vector<16x8xi32> to vector<16x1xi32>
    %24 = vector.broadcast %23 : vector<16x1xi32> to vector<16x128xi32>
    %25 = arith.cmpi eq, %24, %1 : vector<16x128xi32>
    %26 = arith.extui %25 : vector<16x128xi1> to vector<16x128xi32>
    %27 = arith.addi %22, %26 : vector<16x128xi32>
    %28 = vector.extract_strided_slice %0 {offsets = [0, 5], sizes = [16, 1], strides = [1, 1]} : vector<16x8xi32> to vector<16x1xi32>
    %29 = vector.broadcast %28 : vector<16x1xi32> to vector<16x128xi32>
    %30 = arith.cmpi eq, %29, %1 : vector<16x128xi32>
    %31 = arith.extui %30 : vector<16x128xi1> to vector<16x128xi32>
    %32 = arith.addi %27, %31 : vector<16x128xi32>
    %33 = vector.extract_strided_slice %0 {offsets = [0, 6], sizes = [16, 1], strides = [1, 1]} : vector<16x8xi32> to vector<16x1xi32>
    %34 = vector.broadcast %33 : vector<16x1xi32> to vector<16x128xi32>
    %35 = arith.cmpi eq, %34, %1 : vector<16x128xi32>
    %36 = arith.extui %35 : vector<16x128xi1> to vector<16x128xi32>
    %37 = arith.addi %32, %36 : vector<16x128xi32>
    %38 = vector.extract_strided_slice %0 {offsets = [0, 7], sizes = [16, 1], strides = [1, 1]} : vector<16x8xi32> to vector<16x1xi32>
    %39 = vector.broadcast %38 : vector<16x1xi32> to vector<16x128xi32>
    %40 = arith.cmpi eq, %39, %1 : vector<16x128xi32>
    %41 = arith.extui %40 : vector<16x128xi1> to vector<16x128xi32>
    %42 = arith.addi %37, %41 : vector<16x128xi32>
    %43 = arith.sitofp %42 : vector<16x128xi32> to vector<16x128xf32>
    %cst = arith.constant 1.250000e-01 : f32
    %44 = vector.broadcast %cst : f32 to vector<16x128xf32>
    %45 = arith.mulf %43, %44 : vector<16x128xf32>
    %c0_1 = arith.constant 0 : index
    %c0_2 = arith.constant 0 : index
    %46 = vector.load %arg2[%c0_1, %c0_2] : memref<128x128xf32, #tpu.memory_space<vmem>>, vector<128x128xf32>
    %cst_3 = arith.constant dense<0.000000e+00> : vector<16x128xf32>
    %47 = tpu.matmul %45, %46, %cst_3 {dimension_numbers = #tpu.dot_dimension_numbers<[1], [0], [0], [1], [0, 0, 1, 1], [], []>} : vector<16x128xf32>, vector<128x128xf32>, vector<16x128xf32> -> vector<16x128xf32>
    %c0_4 = arith.constant 0 : index
    %c0_5 = arith.constant 0 : index
    %48 = vector.load %arg3[%c0_4, %c0_5] : memref<128x128xf32, #tpu.memory_space<vmem>>, vector<128x128xf32>
    %cst_6 = arith.constant dense<0.000000e+00> : vector<16x128xf32>
    %49 = tpu.matmul %47, %48, %cst_6 {dimension_numbers = #tpu.dot_dimension_numbers<[1], [0], [0], [1], [0, 0, 1, 1], [], []>} : vector<16x128xf32>, vector<128x128xf32>, vector<16x128xf32> -> vector<16x128xf32>
    %c0_7 = arith.constant 0 : index
    %c0_8 = arith.constant 0 : index
    %50 = vector.load %arg4[%c0_7, %c0_8] : memref<1x128xf32, #tpu.memory_space<vmem>>, vector<1x128xf32>
    %51 = vector.broadcast %50 : vector<1x128xf32> to vector<16x128xf32>
    %52 = arith.addf %49, %51 : vector<16x128xf32>
    %cst_9 = arith.constant 0.000000e+00 : f32
    %53 = vector.broadcast %cst_9 : f32 to vector<16x128xf32>
    %54 = arith.maximumf %52, %53 : vector<16x128xf32>
    %c0_10 = arith.constant 0 : index
    %c0_11 = arith.constant 0 : index
    %55 = vector.load %arg5[%c0_10, %c0_11] : memref<128x128xf32, #tpu.memory_space<vmem>>, vector<128x128xf32>
    %cst_12 = arith.constant dense<0.000000e+00> : vector<16x128xf32>
    %56 = tpu.matmul %54, %55, %cst_12 {dimension_numbers = #tpu.dot_dimension_numbers<[1], [0], [0], [1], [0, 0, 1, 1], [], []>} : vector<16x128xf32>, vector<128x128xf32>, vector<16x128xf32> -> vector<16x128xf32>
    %c0_13 = arith.constant 0 : index
    %c0_14 = arith.constant 0 : index
    %57 = vector.load %arg6[%c0_13, %c0_14] : memref<1x128xf32, #tpu.memory_space<vmem>>, vector<1x128xf32>
    %58 = vector.broadcast %57 : vector<1x128xf32> to vector<16x128xf32>
    %59 = arith.addf %56, %58 : vector<16x128xf32>
    %c0_15 = arith.constant 0 : index
    %c0_16 = arith.constant 0 : index
    %60 = vector.load %arg7[%c0_15, %c0_16] : memref<16x128xf32, #tpu.memory_space<vmem>>, vector<16x128xf32>
    tpu.vector_store %arg7[%c0_15, %c0_16], %59 {strides = array<i32>} : memref<16x128xf32, #tpu.memory_space<vmem>>, vector<16x128xf32>,
    return
  }
  func.func @transform_0(%arg0: i32) -> (i32, i32) {
    %c0_i32 = arith.constant 0 : i32
    %c0_i32_0 = arith.constant 0 : i32
    return %arg0, %c0_i32 : i32, i32
  }
  func.func @transform_1(%arg0: i32) -> (i32, i32) {
    %c0_i32 = arith.constant 0 : i32
    %c0_i32_0 = arith.constant 0 : i32
    %c0_i32_1 = arith.constant 0 : i32
    return %c0_i32, %c0_i32_0 : i32, i32
  }
  func.func @transform_2(%arg0: i32) -> (i32, i32) {
    %c0_i32 = arith.constant 0 : i32
    %c0_i32_0 = arith.constant 0 : i32
    %c0_i32_1 = arith.constant 0 : i32
    return %c0_i32, %c0_i32_0 : i32, i32
  }
  func.func @transform_3(%arg0: i32) -> (i32, i32) {
    %c0_i32 = arith.constant 0 : i32
    %c0_i32_0 = arith.constant 0 : i32
    %c0_i32_1 = arith.constant 0 : i32
    return %c0_i32, %c0_i32_0 : i32, i32
  }
  func.func @transform_4(%arg0: i32) -> (i32, i32) {
    %c0_i32 = arith.constant 0 : i32
    %c0_i32_0 = arith.constant 0 : i32
    %c0_i32_1 = arith.constant 0 : i32
    return %c0_i32, %c0_i32_0 : i32, i32
  }
  func.func @transform_5(%arg0: i32) -> (i32, i32) {
    %c0_i32 = arith.constant 0 : i32
    %c0_i32_0 = arith.constant 0 : i32
    %c0_i32_1 = arith.constant 0 : i32
    return %c0_i32, %c0_i32_0 : i32, i32
  }
  func.func @transform_6(%arg0: i32) -> (i32, i32) {
    %c0_i32 = arith.constant 0 : i32
    %c0_i32_0 = arith.constant 0 : i32
    return %arg0, %c0_i32 : i32, i32
  }
}

</mosaic_0001>

<bundles_post_ra>
// kernel: tpu_custom_call.1
= control target key start
LH: loop header
LB: loop body
LE: loop exit
PB: predicated region body
PF: predicated region fallthrough
CT: control target
= control target key end

     0   :  { %11 = vsyncpa [#allocation3], 0  ;;  %s1011_s0 = inlined_call_operand.vmem [shape: s32[16,8], index: 0, kind: input, shape index: {}]   ;;  %s1012_s1 = inlined_call_operand.hbm [shape: f32[128,128], index: 1, kind: input, shape index: {}]   ;;  %s1013_s2 = inlined_call_operand.hbm [shape: f32[128,128], index: 2, kind: input, shape index: {}]   ;;  %s1014_s3 = inlined_call_operand.vmem [shape: f32[1,128], index: 3, kind: input, shape index: {}]   ;;  %s1015_s4 = inlined_call_operand.hbm [shape: f32[128,128], index: 4, kind: input, shape index: {}]   ;;  %s1016_s5 = inlined_call_operand.vmem [shape: f32[1,128], index: 5, kind: input, shape index: {}]   ;;  %s1017_s6 = inlined_call_operand.hbm [shape: f32[16,128], index: 6, kind: output, shape index: {}]  }
   0x1   :  { %12 = vsyncpa [#allocation6], 0 }
   0x2   :  { %13 = vsyncpa [#allocation4], 0  ;;  %s855_s21 = smov [#allocation5]   ;;  %s856_s23 = smov [#allocation2]  }
   0x3   :  { %s33_s22 = sshll.u32 %s855_s21, 4  ;;  %s21_s24 = sshll.u32 %s856_s23, 4  ;;  %s34_s22 = int_to_ptr.vmem [resolvable:$true] %s33_s22  ;;  %s904_s24 = int_to_ptr.vmem [resolvable:$true] %s21_s24 }
   0x4   :  { %s761_s27 = scalar_lea.hbm %s1013_s2, 2048 }
   0x5   :  { %p762_p0 = scmp.ne.s32.totalorder %s1013_s2, %s761_s27  ;;  %p765_p1 = scmp.lt.u32.totalorder %s761_s27, %s1013_s2 }
   0x7   :  { %p767_p2 = pnand %p765_p1, %p762_p0 }
   0x9   :  { %770 = shalt.err (!%p767_p2)
}
   0xa   :  { %s771_s8 = scalar_lea.vmem %s34_s22, 2048  ;;  %p776_p4 = scmp.lt.s32.totalorder %s34_s22, %s34_s22 }
   0xb   :  { %p772_p3 = scmp.ne.s32.totalorder %s34_s22, %s771_s8  ;;  %p777_p5 = scmp.lt.s32.totalorder %s771_s8, %s771_s8 }
   0xd   :  { %p778_p6 = por %p777_p5, %p776_p4 }
   0xf   :  { %p779_p7 = pnand %p778_p6, %p772_p3 }
  0x11   :  { %782 = shalt.err (!%p779_p7)
}
  0x12   :  { %s857_s9 = smov 128   ;;  %s858_s10 = smov 8  }
  0x13   :  { %39 = dma.hbm_to_vmem [thread:$0]  %s1013_s2, 2048, %s34_s22, [#allocation6], %s857_s9, %s857_s9, %s858_s10  }
  0x14   :  { %s783_s15 = scalar_lea.hbm %s1012_s1, 2048 }
  0x15   :  { %p784_p8 = scmp.ne.s32.totalorder %s1012_s1, %s783_s15  ;;  %p787_p9 = scmp.lt.u32.totalorder %s783_s15, %s1012_s1 }
  0x17   :  { %p789_p10 = pnand %p787_p9, %p784_p8 }
  0x19   :  { %792 = shalt.err (!%p789_p10)
}
  0x1a   :  { %s793_s20 = scalar_lea.vmem %s904_s24, 2048  ;;  %p798_p12 = scmp.lt.s32.totalorder %s904_s24, %s904_s24 }
  0x1b   :  { %p794_p11 = scmp.ne.s32.totalorder %s904_s24, %s793_s20  ;;  %p799_p13 = scmp.lt.s32.totalorder %s793_s20, %s793_s20 }
  0x1d   :  { %p800_p0 = por %p799_p13, %p798_p12 }
  0x1f   :  { %p801_p1 = pnand %p800_p0, %p794_p11 }
  0x21   :  { %804 = shalt.err (!%p801_p1)
}
  0x22   :  { %27 = dma.hbm_to_vmem [thread:$0]  %s1012_s1, 2048, %s904_s24, [#allocation3], %s857_s9, %s857_s9, %s858_s10  }
  0x23   :  { %s859_s22 = smov [#allocation7]   ;;  %s805_s27 = scalar_lea.hbm %s1015_s4, 2048 }
  0x24   :  { %s47_s23 = sshll.u32 %s859_s22, 4  ;;  %p806_p2 = scmp.ne.s32.totalorder %s1015_s4, %s805_s27  ;;  %s48_s23 = int_to_ptr.vmem [resolvable:$true] %s47_s23 }
  0x25   :  { %p809_p3 = scmp.lt.u32.totalorder %s805_s27, %s1015_s4 }
  0x27   :  { %p811_p4 = pnand %p809_p3, %p806_p2 }
  0x29   :  { %814 = shalt.err (!%p811_p4)
}
  0x2a   :  { %s815_s8 = scalar_lea.vmem %s48_s23, 2048  ;;  %p820_p6 = scmp.lt.s32.totalorder %s48_s23, %s48_s23 }
  0x2b   :  { %p816_p5 = scmp.ne.s32.totalorder %s48_s23, %s815_s8  ;;  %p821_p7 = scmp.lt.s32.totalorder %s815_s8, %s815_s8 }
  0x2d   :  { %p822_p8 = por %p821_p7, %p820_p6 }
  0x2f   :  { %p823_p9 = pnand %p822_p8, %p816_p5 }
  0x31   :  { %826 = shalt.err (!%p823_p9)
}
  0x32   :  { %53 = dma.hbm_to_vmem [thread:$0]  %s1015_s4, 2048, %s48_s23, [#allocation6], %s857_s9, %s857_s9, %s858_s10  }
  0x33   :  { %849 = dma.done.wait [#allocation3], 2048  }
  0x34   :  { %850 = vsyncadd [#allocation3], 4294965248 }
  0x35   :  { %851 = dma.done.wait [#allocation6], 4096  }
  0x36   :  { %852 = vsyncadd [#allocation6], 4294963200  ;;  %v860_v0 = vmov 0   ;;  %v961_v1 = vld [vmem:[%s1011_s0 + $0x8] sm:$0xff]  ;;  %v65_v2 = vld [vmem:[%s1011_s0] sm:$0xff]  ;;  %v861_v3 = vmov 1   ;;  %v67_v62 = vlaneseq }
  0x37   :  { %749 = vset.pattern.permute.xlu1 %v860_v0  ;;  %747 = vset.pattern.permute.xlu0 %v860_v0  ;;  %v862_v4 = vmov 2   ;;  %v863_v5 = vmov 3   ;;  %v864_v6 = vmov 4   ;;  %v167_v7 = vld [vmem:[#allocation2] sm:$0xff]  ;;  %v168_v8 = vld [vmem:[#allocation2 + $0x8] sm:$0xff]  ;;  %v865_v10 = vmov 5  }
  0x38   :  { %73 = vperm.xlu1 %749, %v961_v1   ;;  %70 = vperm.xlu0 %747, %v65_v2   ;;  %v637_v9 = vpack.c.bf16 %v168_v8, %v167_v7  ;;  %v169_v11 = vld [vmem:[#allocation2 + $0x10] sm:$0xff]  ;;  %v170_v12 = vld [vmem:[#allocation2 + $0x18] sm:$0xff]  ;;  %v866_v14 = vmov 7   ;;  %v171_v15 = vld [vmem:[#allocation2 + $0x20] sm:$0xff]  ;;  %v867_v23 = vmov 6   ;;  %s868_s17 = smov [#allocation8]  }
  0x39   :  { %v641_v13 = vpack.c.bf16 %v170_v12, %v169_v11  ;;  %v172_v16 = vld [vmem:[#allocation2 + $0x28] sm:$0xff]  ;;  %v173_v18 = vld [vmem:[#allocation2 + $0x30] sm:$0xff]  ;;  %v174_v19 = vld [vmem:[#allocation2 + $0x38] sm:$0xff]  ;;  %s463_s18 = sshll.u32 %s868_s17, 4  ;;  %s464_s18 = int_to_ptr.vmem [resolvable:$true] %s463_s18 }
  0x3a   :  { %638 = vmatprep.subr.bf16.mxu0 %v637_v9  ;;  %v645_v17 = vpack.c.bf16 %v172_v16, %v171_v15  ;;  %v649_v20 = vpack.c.bf16 %v174_v19, %v173_v18  ;;  %v175_v21 = vld [vmem:[#allocation2 + $0x40] sm:$0xff]  ;;  %v176_v22 = vld [vmem:[#allocation2 + $0x48] sm:$0xff]  ;;  %v177_v25 = vld [vmem:[#allocation2 + $0x50] sm:$0xff]  ;;  %p832_p11 = scmp.lt.s32.totalorder %s464_s18, %s464_s18 }
  0x3b   :  { %640 = vmatpush3.bf16.msra.mxu0 %v637_v9  ;;  %v653_v24 = vpack.c.bf16 %v176_v22, %v175_v21  ;;  %v178_v26 = vld [vmem:[#allocation2 + $0x58] sm:$0xff]  ;;  %v179_v28 = vld [vmem:[#allocation2 + $0x60] sm:$0xff]  ;;  %v180_v29 = vld [vmem:[#allocation2 + $0x68] sm:$0xff] }
  0x3c   :  { %750 = vset.pattern.permute.xlu1 %v861_v3  ;;  %748 = vset.pattern.permute.xlu0 %v861_v3  ;;  %v657_v27 = vpack.c.bf16 %v178_v26, %v177_v25  ;;  %v661_v30 = vpack.c.bf16 %v180_v29, %v179_v28  ;;  %v181_v31 = vld [vmem:[#allocation2 + $0x70] sm:$0xff]  ;;  %v182_v32 = vld [vmem:[#allocation2 + $0x78] sm:$0xff]  ;;  %v258_v34 = vld [vmem:[#allocation5] sm:$0xff] }
  0x3d   :  { %83 = vperm.xlu1 %750, %v961_v1   ;;  %80 = vperm.xlu0 %748, %v65_v2   ;;  %v665_v33 = vpack.c.bf16 %v182_v32, %v181_v31  ;;  %v259_v35 = vld [vmem:[#allocation5 + $0x8] sm:$0xff]  ;;  %v260_v36 = vld [vmem:[#allocation5 + $0x10] sm:$0xff]  ;;  %v261_v38 = vld [vmem:[#allocation5 + $0x18] sm:$0xff] }
  0x3e   :  { %642 = vmatprep.subr.bf16.mxu0 %v641_v13  ;;  %v669_v37 = vpack.c.bf16 %v259_v35, %v258_v34  ;;  %v673_v39 = vpack.c.bf16 %v261_v38, %v260_v36  ;;  %v262_v40 = vld [vmem:[#allocation5 + $0x20] sm:$0xff]  ;;  %v263_v41 = vld [vmem:[#allocation5 + $0x28] sm:$0xff]  ;;  %v264_v43 = vld [vmem:[#allocation5 + $0x30] sm:$0xff] }
  0x3f   :  { %644 = vmatpush3.bf16.msra.mxu0 %v641_v13  ;;  %v677_v42 = vpack.c.bf16 %v263_v41, %v262_v40  ;;  %v265_v44 = vld [vmem:[#allocation5 + $0x38] sm:$0xff]  ;;  %v266_v46 = vld [vmem:[#allocation5 + $0x40] sm:$0xff]  ;;  %v267_v47 = vld [vmem:[#allocation5 + $0x48] sm:$0xff] }
  0x40   :  { %646 = vmatprep.subr.bf16.mxu0 %v645_v17  ;;  %670 = vmatprep.subr.bf16.mxu1 %v669_v37  ;;  %v681_v45 = vpack.c.bf16 %v265_v44, %v264_v43  ;;  %v685_v48 = vpack.c.bf16 %v267_v47, %v266_v46  ;;  %v268_v49 = vld [vmem:[#allocation5 + $0x50] sm:$0xff]  ;;  %v269_v50 = vld [vmem:[#allocation5 + $0x58] sm:$0xff]  ;;  %v270_v52 = vld [vmem:[#allocation5 + $0x60] sm:$0xff] }
  0x41   :  { %751 = vset.pattern.permute.xlu1 %v862_v4  ;;  %752 = vset.pattern.permute.xlu0 %v862_v4  ;;  %v689_v51 = vpack.c.bf16 %v269_v50, %v268_v49  ;;  %v271_v53 = vld [vmem:[#allocation5 + $0x68] sm:$0xff]  ;;  %v272_v55 = vld [vmem:[#allocation5 + $0x70] sm:$0xff]  ;;  %v273_v56 = vld [vmem:[#allocation5 + $0x78] sm:$0xff] }
  0x42   :  { %92 = vperm.xlu1 %751, %v65_v2   ;;  %95 = vperm.xlu0 %752, %v961_v1   ;;  %v693_v54 = vpack.c.bf16 %v271_v53, %v270_v52  ;;  %v697_v57 = vpack.c.bf16 %v273_v56, %v272_v55  ;;  %v358_v47 = vld [vmem:[#allocation7] sm:$0xff]  ;;  %v360_v49 = vld [vmem:[#allocation7 + $0x10] sm:$0xff] }
  0x43   :  { %648 = vmatpush3.bf16.msra.mxu0 %v645_v17  ;;  %672 = vmatpush3.bf16.msra.mxu1 %v669_v37  ;;  %v362_v53 = vld [vmem:[#allocation7 + $0x20] sm:$0xff]  ;;  %v364_v56 = vld [vmem:[#allocation7 + $0x30] sm:$0xff] }
  0x44   :  { %650 = vmatprep.subr.bf16.mxu0 %v649_v20  ;;  %674 = vmatprep.subr.bf16.mxu1 %v673_v39 }
  0x46   :  { %753 = vset.pattern.permute.xlu1 %v863_v5  ;;  %754 = vset.pattern.permute.xlu0 %v864_v6 }
  0x47   :  { %104 = vperm.xlu1 %753, %v65_v2   ;;  %116 = vperm.xlu0 %754, %v65_v2  }
  0x48   :  { %652 = vmatpush3.bf16.msra.mxu0 %v649_v20  ;;  %676 = vmatpush3.bf16.msra.mxu1 %v673_v39 }
  0x49   :  { %654 = vmatprep.subr.bf16.mxu0 %v653_v24  ;;  %678 = vmatprep.subr.bf16.mxu1 %v677_v42 }
  0x4b   :  { %107 = vperm.xlu1 %753, %v961_v1   ;;  %757 = vset.pattern.permute.xlu0 %v865_v10 }
  0x4c   :  { %131 = vperm.xlu0 %757, %v961_v1   ;;  %656 = vmatpush3.bf16.msra.mxu0 %v653_v24 }
  0x4d   :  { %658 = vmatprep.subr.bf16.mxu0 %v657_v27  ;;  %680 = vmatpush3.bf16.msra.mxu1 %v677_v42 }
  0x4e   :  { %682 = vmatprep.subr.bf16.mxu1 %v681_v45 }
  0x4f   :  { %755 = vset.pattern.permute.xlu1 %v864_v6 }
  0x50   :  { %119 = vperm.xlu1 %755, %v961_v1   ;;  %759 = vset.pattern.permute.xlu0 %v866_v14 }
  0x51   :  { %152 = vperm.xlu0 %759, %v65_v2   ;;  %660 = vmatpush3.bf16.msra.mxu0 %v657_v27 }
  0x52   :  { %662 = vmatprep.subr.bf16.mxu0 %v661_v30  ;;  %684 = vmatpush3.bf16.msra.mxu1 %v681_v45 }
  0x53   :  { %686 = vmatprep.subr.bf16.mxu1 %v685_v48 }
  0x54   :  { %756 = vset.pattern.permute.xlu1 %v865_v10 }
  0x55   :  { %128 = vperm.xlu1 %756, %v65_v2   ;;  %664 = vmatpush3.bf16.msra.mxu0 %v661_v30 }
  0x56   :  { %666 = vmatprep.subr.bf16.mxu0 %v665_v33  ;;  %688 = vmatpush3.bf16.msra.mxu1 %v685_v48  ;;  %v359_v48 = vld [vmem:[#allocation7 + $0x8] sm:$0xff] }
  0x57   :  { %690 = vmatprep.subr.bf16.mxu1 %v689_v51  ;;  %v701_v50 = vpack.c.bf16 %v359_v48, %v358_v47 }
  0x59   :  { %758 = vset.pattern.permute.xlu1 %v867_v23  ;;  %668 = vmatpush3.bf16.msra.mxu0 %v665_v33 }
  0x5a   :  { %140 = vperm.xlu1 %758, %v65_v2   ;;  %692 = vmatpush3.bf16.msra.mxu1 %v689_v51  ;;  %v361_v51 = vld [vmem:[#allocation7 + $0x18] sm:$0xff] }
  0x5b   :  { %694 = vmatprep.subr.bf16.mxu1 %v693_v54  ;;  %v705_v52 = vpack.c.bf16 %v361_v51, %v360_v49  ;;  %702 = vmatprep.subr.bf16.mxu0 %v701_v50 }
  0x5e   :  { %143 = vperm.xlu1 %758, %v961_v1   ;;  %696 = vmatpush3.bf16.msra.mxu1 %v693_v54  ;;  %v363_v54 = vld [vmem:[#allocation7 + $0x28] sm:$0xff] }
  0x5f   :  { %698 = vmatprep.subr.bf16.mxu1 %v697_v57  ;;  %v709_v55 = vpack.c.bf16 %v363_v54, %v362_v53 }
  0x62   :  { %760 = vset.pattern.permute.xlu1 %v866_v14  ;;  %700 = vmatpush3.bf16.msra.mxu1 %v697_v57  ;;  %v365_v57 = vld [vmem:[#allocation7 + $0x38] sm:$0xff] }
  0x63   :  { %155 = vperm.xlu1 %760, %v961_v1   ;;  %v68_v1 = vand.u32 127, %v67_v62  ;;  %v369_v62 = vld [vmem:[#allocation7 + $0x58] sm:$0xff] }
  0xb7   :  { %v74_v58 = vpop.permute.xlu1 %73  ;;  %v71_v60 = vpop.permute.xlu0 %70 }
  0xb8   :  { %vm75_vm0 = vcmp.eq.s32.totalorder %v71_v60, %v68_v1  ;;  %vm76_vm6 = vcmp.eq.s32.totalorder %v74_v58, %v68_v1  ;;  %v366_v58 = vld [vmem:[#allocation7 + $0x40] sm:$0xff] }
  0xb9   :  { %v77_v5 = vsel %vm75_vm0, 1, %v860_v0  ;;  %v78_v19 = vsel %vm76_vm6, 1, %v860_v0 }
  0xbc   :  { %v84_v59 = vpop.permute.xlu1 %83  ;;  %v81_v63 = vpop.permute.xlu0 %80 }
  0xbd   :  { %vm85_vm1 = vcmp.eq.s32.totalorder %v81_v63, %v68_v1  ;;  %vm86_vm4 = vcmp.eq.s32.totalorder %v84_v59, %v68_v1  ;;  %v367_v59 = vld [vmem:[#allocation7 + $0x48] sm:$0xff] }
  0xbe   :  { %v87_v6 = vsel %vm85_vm1, 1, %v860_v0  ;;  %v88_v14 = vsel %vm86_vm4, 1, %v860_v0  ;;  %v717_v60 = vpack.c.bf16 %v367_v59, %v366_v58 }
  0xbf   :  { %v89_v8 = vadd.s32 %v87_v6, %v77_v5  ;;  %v90_v21 = vadd.s32 %v88_v14, %v78_v19  ;;  %v372_v6 = vld [vmem:[#allocation7 + $0x70] sm:$0xff] }
  0xc1   :  { %v93_v61 = vpop.permute.xlu1 %92  ;;  %v96_v3 = vpop.permute.xlu0 %95 }
  0xc2   :  { %vm97_vm2 = vcmp.eq.s32.totalorder %v93_v61, %v68_v1  ;;  %vm98_vm7 = vcmp.eq.s32.totalorder %v96_v3, %v68_v1  ;;  %v368_v61 = vld [vmem:[#allocation7 + $0x50] sm:$0xff] }
  0xc3   :  { %v99_v9 = vsel %vm97_vm2, 1, %v860_v0  ;;  %v100_v20 = vsel %vm98_vm7, 1, %v860_v0  ;;  %v721_v63 = vpack.c.bf16 %v369_v62, %v368_v61 }
  0xc4   :  { %v101_v13 = vadd.s32 %v99_v9, %v89_v8  ;;  %v102_v25 = vadd.s32 %v100_v20, %v90_v21  ;;  %v476_v9 = vld [vmem:[%s1014_s3] ss:$0 sm:$0xff]  ;;  %s827_s3 = scalar_lea.vmem %s464_s18, 256 }
  0xc5   :  { %p828_p10 = scmp.ne.s32.totalorder %s464_s18, %s827_s3  ;;  %p833_p12 = scmp.lt.s32.totalorder %s827_s3, %s827_s3 }
  0xc6   :  { %v105_v2 = vpop.permute.xlu1 %104  ;;  %v117_v7 = vpop.permute.xlu0 %116 }
  0xc7   :  { %vm109_vm3 = vcmp.eq.s32.totalorder %v105_v2, %v68_v1  ;;  %vm121_vm5 = vcmp.eq.s32.totalorder %v117_v7, %v68_v1  ;;  %v371_v2 = vld [vmem:[#allocation7 + $0x68] sm:$0xff]  ;;  %v373_v7 = vld [vmem:[#allocation7 + $0x78] sm:$0xff]  ;;  %p834_p13 = por %p833_p12, %p832_p11 }
  0xc8   :  { %v111_v11 = vsel %vm109_vm3, 1, %v860_v0  ;;  %v123_v17 = vsel %vm121_vm5, 1, %v860_v0  ;;  %v729_v8 = vpack.c.bf16 %v373_v7, %v372_v6 }
  0xc9   :  { %v113_v15 = vadd.s32 %v111_v11, %v101_v13  ;;  %p835_p0 = pnand %p834_p13, %p828_p10 }
  0xca   :  { %v108_v4 = vpop.permute.xlu1 %107 }
  0xcb   :  { %v132_v12 = vpop.permute.xlu0 %131  ;;  %vm110_vm8 = vcmp.eq.s32.totalorder %v108_v4, %v68_v1  ;;  %v125_v23 = vadd.s32 %v123_v17, %v113_v15 }
  0xcc   :  { %v112_v24 = vsel %vm110_vm8, 1, %v860_v0  ;;  %vm134_vm13 = vcmp.eq.s32.totalorder %v132_v12, %v68_v1 }
  0xcd   :  { %v114_v29 = vadd.s32 %v112_v24, %v102_v25  ;;  %v136_v35 = vsel %vm134_vm13, 1, %v860_v0 }
  0xcf   :  { %v120_v10 = vpop.permute.xlu1 %119 }
  0xd0   :  { %v153_v18 = vpop.permute.xlu0 %152  ;;  %vm122_vm10 = vcmp.eq.s32.totalorder %v120_v10, %v68_v1 }
  0xd1   :  { %vm157_vm11 = vcmp.eq.s32.totalorder %v153_v18, %v68_v1  ;;  %v124_v27 = vsel %vm122_vm10, 1, %v860_v0 }
  0xd2   :  { %v159_v31 = vsel %vm157_vm11, 1, %v860_v0  ;;  %v126_v33 = vadd.s32 %v124_v27, %v114_v29 }
  0xd4   :  { %v129_v16 = vpop.permute.xlu1 %128  ;;  %v138_v39 = vadd.s32 %v136_v35, %v126_v33 }
  0xd5   :  { %vm133_vm9 = vcmp.eq.s32.totalorder %v129_v16, %v68_v1  ;;  %v477_v16 = vld [vmem:[%s1016_s5] ss:$0 sm:$0xff] }
  0xd6   :  { %v135_v22 = vsel %vm133_vm9, 1, %v860_v0 }
  0xd7   :  { %v137_v28 = vadd.s32 %v135_v22, %v125_v23 }
  0xd9   :  { %v141_v26 = vpop.permute.xlu1 %140 }
  0xda   :  { %vm145_vm12 = vcmp.eq.s32.totalorder %v141_v26, %v68_v1 }
  0xdb   :  { %v147_v30 = vsel %vm145_vm12, 1, %v860_v0 }
  0xdc   :  { %v149_v32 = vadd.s32 %v147_v30, %v137_v28 }
  0xdd   :  { %v144_v34 = vpop.permute.xlu1 %143 }
  0xde   :  { %vm146_vm14 = vcmp.eq.s32.totalorder %v144_v34, %v68_v1  ;;  %v161_v36 = vadd.s32 %v159_v31, %v149_v32 }
  0xdf   :  { %v148_v37 = vsel %vm146_vm14, 1, %v860_v0 }
  0xe0   :  { %v163_v38 = vcvt.s32.f32 %v161_v36  ;;  %v150_v42 = vadd.s32 %v148_v37, %v138_v39 }
  0xe2   :  { %v156_v40 = vpop.permute.xlu1 %155  ;;  %v165_v41 = vmul.f32 0.125, %v163_v38 }
  0xe3   :  { %vm158_vm15 = vcmp.eq.s32.totalorder %v156_v40, %v68_v1  ;;  %v370_v1 = vld [vmem:[#allocation7 + $0x60] sm:$0xff] }
  0xe4   :  { %v160_v43 = vsel %vm158_vm15, 1, %v860_v0  ;;  %564 = vmatprep.mubr.f32.mxu0 %v165_v41  ;;  %v713_v0 = vpack.c.bf16 %v365_v57, %v364_v56  ;;  %v725_v3 = vpack.c.bf16 %v371_v2, %v370_v1 }
  0xe5   :  { %v162_v44 = vadd.s32 %v160_v43, %v150_v42 }
  0xe7   :  { %v164_v45 = vcvt.s32.f32 %v162_v44 }
  0xe9   :  { %v166_v46 = vmul.f32 0.125, %v164_v45 }
  0xeb   :  { %565 = vmatmul.mubr.f32.vlgmr.msra.gmra.mrb[0].mxu0 %v166_v46 }
  0xec   :  { %704 = vmatpush3.bf16.msra.mxu0 %v701_v50 }
  0xed   :  { %706 = vmatprep.subr.bf16.mxu0 %v705_v52 }
  0xf0   :  { %708 = vmatpush3.bf16.msra.mxu0 %v705_v52 }
  0xf1   :  { %710 = vmatprep.subr.bf16.mxu0 %v709_v55 }
  0xf4   :  { %712 = vmatpush3.bf16.msra.mxu0 %v709_v55 }
  0xf5   :  { %714 = vmatprep.subr.bf16.mxu0 %v713_v0 }
  0xf8   :  { %716 = vmatpush3.bf16.msra.mxu0 %v713_v0 }
  0xf9   :  { %718 = vmatprep.subr.bf16.mxu0 %v717_v60 }
  0xfc   :  { %720 = vmatpush3.bf16.msra.mxu0 %v717_v60 }
  0xfd   :  { %722 = vmatprep.subr.bf16.mxu0 %v721_v63 }
 0x100   :  { %724 = vmatpush3.bf16.msra.mxu0 %v721_v63 }
 0x101   :  { %726 = vmatprep.subr.bf16.mxu0 %v725_v3 }
 0x104   :  { %728 = vmatpush3.bf16.msra.mxu0 %v725_v3 }
 0x105   :  { %730 = vmatprep.subr.bf16.mxu0 %v729_v8 }
 0x108   :  { %732 = vmatpush3.bf16.msra.mxu0 %v729_v8 }
 0x1be   :  { %v566_v4 = vpop.f32.mrb[0].mxu0 }
 0x1bf   :  { %v249_v5 = vpop.f32.mrb[1].mxu0 }
 0x1c0   :  { %599 = vmatprep.mubr.f32.mxu1 %v249_v5 }
 0x1c1   :  { %600 = vmatmul.mubr.f32.vlgmr.msra.gmra.mrb[0].mxu1 %v566_v4 }
 0x294   :  { %v601_v10 = vpop.f32.mrb[0].mxu1 }
 0x295   :  { %v353_v11 = vadd.f32 %v601_v10, %v476_v9  ;;  %v347_v12 = vpop.f32.mrb[1].mxu1 }
 0x296   :  { %v348_v13 = vadd.f32 %v476_v9, %v347_v12 }
 0x297   :  { %v357_v15 = vmax.f32 %v353_v11, 0.0 }
 0x298   :  { %v356_v14 = vmax.f32 %v348_v13, 0.0 }
 0x29a   :  { %634 = vmatprep.mubr.f32.mxu0 %v356_v14 }
 0x29b   :  { %635 = vmatmul.mubr.f32.vlgmr.msra.gmra.mrb[2].mxu0 %v357_v15 }
 0x36e   :  { %v636_v17 = vpop.f32.mrb[2].mxu0 }
 0x36f   :  { %v453_v18 = vadd.f32 %v636_v17, %v477_v16  ;;  %v447_v19 = vpop.f32.mrb[3].mxu0 }
 0x370   :  { %v448_v20 = vadd.f32 %v477_v16, %v447_v19 }
 0x371   :  { %457 = vst [vmem:[#allocation8 + $0x8] sm:$0xff] %v453_v18 }
 0x372   :  { %456 = vst [vmem:[#allocation8] sm:$0xff] %v448_v20 }
 0x373   :  { %838 = shalt.err (!%p835_p0)
}
 0x374   :  { %s839_s5 = scalar_lea.hbm %s1017_s6, 256 }
 0x375   :  { %p840_p1 = scmp.ne.s32.totalorder %s1017_s6, %s839_s5  ;;  %p843_p2 = scmp.lt.u32.totalorder %s839_s5, %s1017_s6 }
 0x377   :  { %p845_p3 = pnand %p843_p2, %p840_p1 }
 0x379   :  { %848 = shalt.err (!%p845_p3)
}
 0x37a   :  { %469 = dma.vmem_to_hbm [thread:$0]  %s464_s18, 256, %s1017_s6, [#allocation4], %s857_s9, %s857_s9, %s858_s10  }
 0x37b   :  { %853 = dma.done.wait [#allocation4], 256  }
 0x37c   :  { %854 = vsyncadd [#allocation4], 4294967040 }
 0x37d   :  { %473 = vsyncpa [#allocation3], 1 }
 0x37e   :  { %474 = vsyncpa [#allocation6], 1 }
 0x37f   :  { %475 = vsyncpa [#allocation4], 1 }

</bundles_post_ra>
